<compile_context>
chip_gen: v6e
topology: v6e:2x2x1
jax: 0.10.0
libtpu: 0.0.40
codegen_flags: <defaults>
</compile_context>

<pallas_src>
import functools
import math

import jax
import jax.numpy as jnp
import numpy as np
from jax.experimental import pallas as pl
from jax.experimental.pallas import tpu as pltpu


def _self_attn_kernel(x_ref, wqkv_ref, bqkv_ref, wo_ref, bo_ref, o_ref, *,
                      seq_len, mxu_dtype):
    bs, d = x_ref.shape                       # (BT*S, D_real), static
    dpad = wqkv_ref.shape[1] // 3             # 128-aligned per-head width
    bt = bs // seq_len

    x = x_ref[...].astype(mxu_dtype)

    # Fused qkv projection: one MXU push, f32 accumulation, one bias add.
    qkv = jnp.dot(x, wqkv_ref[...].astype(mxu_dtype),
                  preferred_element_type=jnp.float32)
    qkv = qkv + bqkv_ref[...].astype(jnp.float32)            # (BT*S, 3*Dpad)

    # 128-lane-aligned slices: free views, no cross-lane data movement.
    q = qkv[:, 0 * dpad:1 * dpad].reshape(bt, seq_len, dpad)
    k = qkv[:, 1 * dpad:2 * dpad].reshape(bt, seq_len, dpad)
    v = qkv[:, 2 * dpad:3 * dpad].reshape(bt, seq_len, dpad)

    # Scale q (S*D work) rather than the (S,S) score matrix. Use the real D.
    q = q * (1.0 / math.sqrt(d))

    # Scores: contract feature dims directly (no k transpose / XLU pass).
    # Padded columns of q/k are exactly zero, so they don't affect the sum.
    scores = jnp.einsum("bqd,bkd->bqk",
                        q.astype(mxu_dtype), k.astype(mxu_dtype),
                        preferred_element_type=jnp.float32)   # (BT, S, S)

    # Numerically stable softmax, kept in f32.
    m = jnp.max(scores, axis=-1, keepdims=True)
    p = jnp.exp(scores - m)
    row_sum = jnp.sum(p, axis=-1, keepdims=True)              # (BT, S, 1)

    # Un-normalized p @ v, then scale the (S, Dpad) result by the reciprocal
    # of the row sum (cheaper than dividing the full (S, S) p matrix).
    z = jnp.einsum("bqk,bkd->bqd",
                   p.astype(mxu_dtype), v.astype(mxu_dtype),
                   preferred_element_type=jnp.float32)        # (BT, S, Dpad)
    z = z * pl.reciprocal(row_sum)   # exact recip: test asserts 1e-5 vs ref

    # Output projection on the flattened slab; lane-dense (Dout_pad) store.
    z2d = z.astype(mxu_dtype).reshape(bs, dpad)
    out = jnp.dot(z2d, wo_ref[...].astype(mxu_dtype),
                  preferred_element_type=jnp.float32)
    out = out + bo_ref[...].astype(jnp.float32)
    o_ref[...] = out.astype(o_ref.dtype)


def self_attention(x, w_qkv, b_qkv, w_o, b_o, *, batch_tile=None,
                   mxu_dtype=None):
    """PyTorch parameter layout:
         x     : (B, S, D)
         w_qkv : (3D, D)   nn.Linear(input_dim, 3*input_dim).weight
         b_qkv : (3D,)
         w_o   : (Dout, D) nn.Linear(input_dim, output_dim).weight
         b_o   : (Dout,)
       mxu_dtype: dtype for MXU operands (default = x.dtype, exact). Pass
                  jnp.bfloat16 on v6e/v7x for full MXU rate (relax tolerances).
    """
    B, S, D = x.shape
    Dout = w_o.shape[0]
    LANE = 128
    Dpad = ((D + LANE - 1) // LANE) * LANE        # per-head lane-aligned width
    Dout_pad = ((Dout + LANE - 1) // LANE) * LANE

    if mxu_dtype is None:
        mxu_dtype = x.dtype

    # Default batch tile: >= 2 grid steps (v7x megacore + DMA/compute overlap),
    # forced to divide B so no padded batch rows flow through exp().
    BT = max(1, math.ceil(B / 2)) if batch_tile is None else max(1, min(batch_tile, B))
    while B % BT:
        BT -= 1

    wdtype = w_qkv.dtype

    # Layout glue (once, outside the kernel):
    #  * fused qkv weight transposed to (D, 3*Dpad); q/k/v column groups each
    #    start on a 128-lane boundary, padded columns are zero.
    #  * output projection padded to (Dpad, Dout_pad) for a lane-dense store.
    wqkv_t = w_qkv.T                                   # (D, 3D), cols [q|k|v]
    wqkv = jnp.zeros((D, 3 * Dpad), wdtype)
    bqkv = jnp.zeros((1, 3 * Dpad), wdtype)
    for i in range(3):
        wqkv = wqkv.at[:, i * Dpad:i * Dpad + D].set(wqkv_t[:, i * D:(i + 1) * D])
        bqkv = bqkv.at[0, i * Dpad:i * Dpad + D].set(b_qkv[i * D:(i + 1) * D])

    wo = jnp.zeros((Dpad, Dout_pad), wdtype).at[:D, :Dout].set(w_o.T)
    bo = jnp.zeros((1, Dout_pad), wdtype).at[0, :Dout].set(b_o)

    x2d = x.reshape(B * S, D)

    kernel = functools.partial(_self_attn_kernel, seq_len=S, mxu_dtype=mxu_dtype)

    out2d = pl.pallas_call(
        kernel,
        out_shape=jax.ShapeDtypeStruct((B * S, Dout_pad), x.dtype),
        grid_spec=pltpu.PrefetchScalarGridSpec(
            num_scalar_prefetch=0,
            grid=(B // BT,),
            in_specs=[
                pl.BlockSpec((BT * S, D), lambda b: (b, 0)),        # x slab
                pl.BlockSpec((D, 3 * Dpad), lambda b: (0, 0)),      # fused Wqkv
                pl.BlockSpec((1, 3 * Dpad), lambda b: (0, 0)),      # fused bqkv
                pl.BlockSpec((Dpad, Dout_pad), lambda b: (0, 0)),   # Wo (padded)
                pl.BlockSpec((1, Dout_pad), lambda b: (0, 0)),      # bo (padded)
            ],
            out_specs=pl.BlockSpec((BT * S, Dout_pad), lambda b: (b, 0)),
        ),
        compiler_params=pltpu.CompilerParams(
            dimension_semantics=("parallel",),
            vmem_limit_bytes=32 * 1024 * 1024),   # safe on v7x (64 MiB VMEM)
    )(x2d, wqkv, bqkv, wo, bo)

    return out2d[:, :Dout].reshape(B, S, Dout)


def reference(x, w_qkv, b_qkv, w_o, b_o):
    qkv = x @ w_qkv.T + b_qkv
    D = x.shape[-1]
    q, k, v = qkv[..., :D], qkv[..., D:2 * D], qkv[..., 2 * D:]
    scores = jnp.einsum("bqd,bkd->bqk", q, k) / math.sqrt(D)
    p = jax.nn.softmax(scores, axis=-1)
    z = jnp.einsum("bqk,bkd->bqd", p, v)
    return z @ w_o.T + b_o


if __name__ == "__main__":
    B, S, D, Dout = 2, 8, 32, 32

    key = jax.random.PRNGKey(0)
    kx, kqkv, kbqkv, ko, kbo = jax.random.split(key, 5)

    x = jax.random.normal(kx, (B, S, D), dtype=jnp.float32)

    # nn.Linear(input_dim, 3*input_dim): weight (3D, D), bias (3D,)
    bound = 1.0 / math.sqrt(D)
    w_qkv = jax.random.uniform(kqkv, (3 * D, D), jnp.float32, -bound, bound)
    b_qkv = jax.random.uniform(kbqkv, (3 * D,), jnp.float32, -bound, bound)

    # nn.Linear(input_dim, output_dim): weight (Dout, D), bias (Dout,)
    w_o = jax.random.uniform(ko, (Dout, D), jnp.float32, -bound, bound)
    b_o = jax.random.uniform(kbo, (Dout,), jnp.float32, -bound, bound)

    out = self_attention(x, w_qkv, b_qkv, w_o, b_o)
    out = jax.block_until_ready(out)

    ref = reference(x, w_qkv, b_qkv, w_o, b_o)
    np.testing.assert_allclose(np.asarray(out), np.asarray(ref),
                               atol=1e-5, rtol=1e-5)

    print("KERNEL_OK")
</pallas_src>

<mosaic_0001>
module attributes {stable_mosaic.version = 11 : i64} {
  func.func @_self_attn_kernel(%arg0: i32, %arg1: memref<8x32xf32, #tpu.memory_space<vmem>>, %arg2: memref<32x384xf32, #tpu.memory_space<vmem>>, %arg3: memref<1x384xf32, #tpu.memory_space<vmem>>, %arg4: memref<128x128xf32, #tpu.memory_space<vmem>>, %arg5: memref<1x128xf32, #tpu.memory_space<vmem>>, %arg6: memref<8x128xf32, #tpu.memory_space<vmem>>) attributes {dimension_semantics = [#tpu.dimension_semantics<parallel>], iteration_bounds = array<i64: 2>, scalar_prefetch = 0 : i64, scratch_operands = 0 : i64, tpu.core_type = #tpu.core_type<tc>, window_params = [{transform_indices = @transform_0, window_bounds = array<i64: 8, 32>}, {pipeline_mode = #tpu.pipeline_mode<synchronous>, transform_indices = @transform_1, window_bounds = array<i64: 32, 384>}, {pipeline_mode = #tpu.pipeline_mode<synchronous>, transform_indices = @transform_2, window_bounds = array<i64: 1, 384>}, {pipeline_mode = #tpu.pipeline_mode<synchronous>, transform_indices = @transform_3, window_bounds = array<i64: 128, 128>}, {pipeline_mode = #tpu.pipeline_mode<synchronous>, transform_indices = @transform_4, window_bounds = array<i64: 1, 128>}, {transform_indices = @transform_5, window_bounds = array<i64: 8, 128>}]} {
    %c0 = arith.constant 0 : index
    %c0_0 = arith.constant 0 : index
    %0 = vector.load %arg1[%c0, %c0_0] : memref<8x32xf32, #tpu.memory_space<vmem>>, vector<8x32xf32>
    %c0_1 = arith.constant 0 : index
    %c0_2 = arith.constant 0 : index
    %1 = vector.load %arg2[%c0_1, %c0_2] : memref<32x384xf32, #tpu.memory_space<vmem>>, vector<32x384xf32>
    %cst = arith.constant dense<0.000000e+00> : vector<8x384xf32>
    %2 = tpu.matmul %0, %1, %cst {dimension_numbers = #tpu.dot_dimension_numbers<[1], [0], [0], [1], [0, 0, 1, 1], [], []>} : vector<8x32xf32>, vector<32x384xf32>, vector<8x384xf32> -> vector<8x384xf32>
    %c0_3 = arith.constant 0 : index
    %c0_4 = arith.constant 0 : index
    %3 = vector.load %arg3[%c0_3, %c0_4] : memref<1x384xf32, #tpu.memory_space<vmem>>, vector<1x384xf32>
    %4 = vector.broadcast %3 : vector<1x384xf32> to vector<8x384xf32>
    %5 = arith.addf %2, %4 : vector<8x384xf32>
    %6 = vector.extract_strided_slice %5 {offsets = [0, 0], sizes = [8, 128], strides = [1, 1]} : vector<8x384xf32> to vector<8x128xf32>
    %7 = vector.shape_cast %6 : vector<8x128xf32> to vector<1x8x128xf32>
    %8 = vector.extract_strided_slice %5 {offsets = [0, 128], sizes = [8, 128], strides = [1, 1]} : vector<8x384xf32> to vector<8x128xf32>
    %9 = vector.shape_cast %8 : vector<8x128xf32> to vector<1x8x128xf32>
    %10 = vector.extract_strided_slice %5 {offsets = [0, 256], sizes = [8, 128], strides = [1, 1]} : vector<8x384xf32> to vector<8x128xf32>
    %11 = vector.shape_cast %10 : vector<8x128xf32> to vector<1x8x128xf32>
    %cst_5 = arith.constant 0.176776692 : f32
    %12 = vector.broadcast %cst_5 : f32 to vector<1x8x128xf32>
    %13 = arith.mulf %7, %12 : vector<1x8x128xf32>
    "tpu.trace_start"() <{level = 10 : i32, message = "bqd,bkd->bqk"}> : () -> ()
    %cst_6 = arith.constant dense<0.000000e+00> : vector<1x8x8xf32>
    %14 = tpu.matmul %13, %9, %cst_6 {dimension_numbers = #tpu.dot_dimension_numbers<[2], [2], [1], [1], [0, 0, 0, 1, 1, 1], [0], [0]>} : vector<1x8x128xf32>, vector<1x8x128xf32>, vector<1x8x8xf32> -> vector<1x8x8xf32>
    "tpu.trace_stop"() : () -> ()
    %cst_7 = arith.constant dense<0xFF800000> : vector<1x8xf32>
    %15 = vector.multi_reduction <maximumf>, %14, %cst_7 [2] : vector<1x8x8xf32> to vector<1x8xf32>
    %16 = vector.shape_cast %15 : vector<1x8xf32> to vector<1x8x1xf32>
    %17 = vector.broadcast %16 : vector<1x8x1xf32> to vector<1x8x8xf32>
    %18 = arith.subf %14, %17 : vector<1x8x8xf32>
    %19 = math.exp %18 : vector<1x8x8xf32>
    %cst_8 = arith.constant dense<0.000000e+00> : vector<1x8xf32>
    %20 = vector.multi_reduction <add>, %19, %cst_8 [2] : vector<1x8x8xf32> to vector<1x8xf32>
    %21 = vector.shape_cast %20 : vector<1x8xf32> to vector<1x8x1xf32>
    "tpu.trace_start"() <{level = 10 : i32, message = "bqk,bkd->bqd"}> : () -> ()
    %cst_9 = arith.constant dense<0.000000e+00> : vector<1x8x128xf32>
    %22 = tpu.matmul %19, %11, %cst_9 {dimension_numbers = #tpu.dot_dimension_numbers<[2], [1], [1], [2], [0, 0, 0, 1, 1, 2], [0], [0]>} : vector<1x8x8xf32>, vector<1x8x128xf32>, vector<1x8x128xf32> -> vector<1x8x128xf32>
    "tpu.trace_stop"() : () -> ()
    %23 = tpu.reciprocal %21 : vector<1x8x1xf32> -> vector<1x8x1xf32>
    %24 = vector.broadcast %23 : vector<1x8x1xf32> to vector<1x8x128xf32>
    %25 = arith.mulf %22, %24 : vector<1x8x128xf32>
    %26 = vector.shape_cast %25 : vector<1x8x128xf32> to vector<8x128xf32>
    %c0_10 = arith.constant 0 : index
    %c0_11 = arith.constant 0 : index
    %27 = vector.load %arg4[%c0_10, %c0_11] : memref<128x128xf32, #tpu.memory_space<vmem>>, vector<128x128xf32>
    %cst_12 = arith.constant dense<0.000000e+00> : vector<8x128xf32>
    %28 = tpu.matmul %26, %27, %cst_12 {dimension_numbers = #tpu.dot_dimension_numbers<[1], [0], [0], [1], [0, 0, 1, 1], [], []>} : vector<8x128xf32>, vector<128x128xf32>, vector<8x128xf32> -> vector<8x128xf32>
    %c0_13 = arith.constant 0 : index
    %c0_14 = arith.constant 0 : index
    %29 = vector.load %arg5[%c0_13, %c0_14] : memref<1x128xf32, #tpu.memory_space<vmem>>, vector<1x128xf32>
    %30 = vector.broadcast %29 : vector<1x128xf32> to vector<8x128xf32>
    %31 = arith.addf %28, %30 : vector<8x128xf32>
    %c0_15 = arith.constant 0 : index
    %c0_16 = arith.constant 0 : index
    %32 = vector.load %arg6[%c0_15, %c0_16] : memref<8x128xf32, #tpu.memory_space<vmem>>, vector<8x128xf32>
    tpu.vector_store %arg6[%c0_15, %c0_16], %31 {strides = array<i32>} : memref<8x128xf32, #tpu.memory_space<vmem>>, vector<8x128xf32>,
    return
  }
  func.func @transform_0(%arg0: i32) -> (i32, i32) {
    %c0_i32 = arith.constant 0 : i32
    %c0_i32_0 = arith.constant 0 : i32
    return %arg0, %c0_i32 : i32, i32
  }
  func.func @transform_1(%arg0: i32) -> (i32, i32) {
    %c0_i32 = arith.constant 0 : i32
    %c0_i32_0 = arith.constant 0 : i32
    %c0_i32_1 = arith.constant 0 : i32
    return %c0_i32, %c0_i32_0 : i32, i32
  }
  func.func @transform_2(%arg0: i32) -> (i32, i32) {
    %c0_i32 = arith.constant 0 : i32
    %c0_i32_0 = arith.constant 0 : i32
    %c0_i32_1 = arith.constant 0 : i32
    return %c0_i32, %c0_i32_0 : i32, i32
  }
  func.func @transform_3(%arg0: i32) -> (i32, i32) {
    %c0_i32 = arith.constant 0 : i32
    %c0_i32_0 = arith.constant 0 : i32
    %c0_i32_1 = arith.constant 0 : i32
    return %c0_i32, %c0_i32_0 : i32, i32
  }
  func.func @transform_4(%arg0: i32) -> (i32, i32) {
    %c0_i32 = arith.constant 0 : i32
    %c0_i32_0 = arith.constant 0 : i32
    %c0_i32_1 = arith.constant 0 : i32
    return %c0_i32, %c0_i32_0 : i32, i32
  }
  func.func @transform_5(%arg0: i32) -> (i32, i32) {
    %c0_i32 = arith.constant 0 : i32
    %c0_i32_0 = arith.constant 0 : i32
    return %arg0, %c0_i32 : i32, i32
  }
}

</mosaic_0001>

<bundles_post_ra>
// kernel: tpu_custom_call.1
= control target key start
LH: loop header
LB: loop body
LE: loop exit
PB: predicated region body
PF: predicated region fallthrough
CT: control target
= control target key end

     0   :  { %10 = vsyncpa [#allocation3], 0  ;;  %s1380_s0 = inlined_call_operand.hbm [shape: f32[16,32], index: 0, kind: input, shape index: {}]   ;;  %s1381_s1 = inlined_call_operand.hbm [shape: f32[32,384], index: 1, kind: input, shape index: {}]   ;;  %s1382_s2 = inlined_call_operand.vmem [shape: f32[1,384], index: 2, kind: input, shape index: {}]   ;;  %s1383_s3 = inlined_call_operand.hbm [shape: f32[128,128], index: 3, kind: input, shape index: {}]   ;;  %s1384_s4 = inlined_call_operand.vmem [shape: f32[1,128], index: 4, kind: input, shape index: {}]   ;;  %s1385_s5 = inlined_call_operand.hbm [shape: f32[16,128], index: 5, kind: output, shape index: {}]  }
   0x1   :  { %12 = vsyncpa [#allocation3 + $0x1], 0 }
   0x2   :  { %13 = vsyncpa [#allocation6], 0 }
   0x3   :  { %14 = vsyncpa [#allocation4], 0 }
   0x4   :  { %16 = vsyncpa [#allocation4 + $0x1], 0  ;;  %s1166_s18 = smov 0   ;;  %s1168_s19 = smov 0  }
   0x5   :  { %s1170_s20 = smov 0   ;;  %s1172_s21 = smov 0  }
   0x6 LB: > { %s1187_s22 = sadd.s32 4294967295, %s1124_s21   ;;  %s797_s23 = sadd.s32 4294967294, %s1124_s21   ;;  %s1124_s21 = sphi %s1172_s21, %s1407_s21   ;;  %s1120_s20 = sphi %s1170_s20, %s1406_s20   ;;  %s1116_s19 = sphi %s1168_s19, %s1405_s19   ;;  %s1112_s18 = sphi %s1166_s18, %s1404_s18  }
   0x7   : > { %p42_p0 = scmp.ne.s32.totalorder %s1116_s19, %s1112_s18  ;;  %p1386_p1 = scmp.eq.s32.totalorder %s1187_s22, 0 }
   0x8   : > { %p156_p3 = scmp.eq.s32.totalorder %s797_s23, 1  ;;  %p798_p5 = scmp.ge.s32.totalorder %s1124_s21, 1 }
   0x9   : > { %p1196_p4 = por %p1386_p1, %p42_p0  ;;  %p163_p7 = scmp.lt.s32.totalorder %s1124_s21, 3 }
   0xa   : > { %p1201_p6 = por %p156_p3, %p42_p0  ;;  %s1126_s27 = smov [#allocation5]  }
   0xb   : > { %s1390_s24 = scalar_select %p1196_p4, 1, 0 }
   0xc   : > { %s1391_s25 = scalar_select %p1201_p6, 1, 0 }
   0xd   : > { %p1206_p8 = pnand %p798_p5, %p163_p7  ;;  %s175_s28 = sshll.u32 %s1126_s27, 4  ;;  %s176_s28 = int_to_ptr.vmem [resolvable:$true] %s175_s28 }
   0xe   : > { %s1127_s30 = smov [#allocation7]   ;;  %s987_s7 = scalar_lea.vmem %s176_s28, 1536 }
   0xf   : > { %s1392_s26 = scalar_select %p1206_p8, 1, 0 }
  0x10   : > { %p911_p9 = pneg %p1206_p8  ;;  %s191_s6 = sshll.u32 %s1127_s30, 4  ;;  %s192_s6 = int_to_ptr.vmem [resolvable:$true] %s191_s6 }
  0x11   : > { %p988_p13 = scmp.ne.s32.totalorder %s176_s28, %s987_s7  ;;  %p995_p5 = scmp.lt.s32.totalorder %s176_s28, %s176_s28 }
  0x12   : > { %p1215_p11 = pnand %p911_p9, %p1386_p1  ;;  %p996_p7 = scmp.lt.s32.totalorder %s987_s7, %s987_s7 }
  0x14   : > { %p978_p12 = pneg %p1215_p11  ;;  %p997_p10 = por %p996_p7, %p995_p5 }
  0x16   : > { %p990_p0 = pnand %p988_p13, %p978_p12 }
  0x18   : > { %p991_p3 = pneg %p990_p0 }
  0x1a   : > { %p998_p9 = pnand %p997_p10, %p991_p3 }
  0x1c   : > { %1001 = shalt.err (!%p998_p9)
}
  0x1d   : > { %s1128_s8 = smov 384   ;;  %s1129_s9 = smov 24  }
  0x1e   : > { %914 = dma.hbm_to_vmem [thread:$0]  (!%p1215_p11), %s1381_s1, 1536, %s176_s28, [#allocation6], %s1128_s8, %s1128_s8, %s1129_s9  }
  0x1f   : > { %s1013_s12 = scalar_lea.vmem %s192_s6, 2048  ;;  %p1021_p2 = scmp.lt.s32.totalorder %s192_s6, %s192_s6 }
  0x20   : > { %p1014_p1 = scmp.ne.s32.totalorder %s192_s6, %s1013_s12  ;;  %p1022_p6 = scmp.lt.s32.totalorder %s1013_s12, %s1013_s12 }
  0x22   : > { %p1016_p13 = pnand %p1014_p1, %p978_p12  ;;  %p1023_p5 = por %p1022_p6, %p1021_p2 }
  0x24   : > { %p1017_p0 = pneg %p1016_p13 }
  0x26   : > { %p1024_p10 = pnand %p1023_p5, %p1017_p0 }
  0x28   : > { %1027 = shalt.err (!%p1024_p10)
}
  0x29   : > { %s1130_s13 = smov 128   ;;  %s1131_s14 = smov 8  }
  0x2a   : > { %917 = dma.hbm_to_vmem [thread:$0]  (!%p1215_p11), %s1383_s3, 2048, %s192_s6, [#allocation6], %s1130_s13, %s1130_s13, %s1131_s14  }
  0x2b   : > { %s1238_s17 = sadd.s32 1, %s1124_s21   ;;  %s29_s27 = sadd.s32 1, %s1120_s20 }
  0x2c   : > { %s26_s23 = ssub.s32 %s1124_s21, %s1238_s17  ;;  %p36_p2 = scmp.ne.s32.totalorder %s1120_s20, %s1116_s19 }
  0x2d   : > { %p27_p1 = scmp.eq.s32.totalorder %s26_s23, 0  ;;  %p37_p6 = scmp.eq.s32.totalorder %s1124_s21, 0 }
  0x2e   : > { %p1394_p3 = scmp.eq.s32.totalorder %s1187_s22, 1  ;;  %p928_p9 = scmp.lt.s32.totalorder %s1124_s21, 2 }
  0x2f   : > { %s1247_s28 = scalar_select %p27_p1, %s1120_s20, %s29_s27  }
  0x30   : > { %p38_p12 = por %p37_p6, %p36_p2  ;;  %p1251_p7 = por %p1394_p3, %p36_p2 }
  0x31   : > { %s208_s29 = sand.u32 1, %s1120_s20   ;;  %s803_s6 = sshll.u32 %s1124_s21, 7 }
  0x32   : > { %s1395_s30 = scalar_select %p1251_p7, 1, 0 }
  0x33   : > { %s802_s7 = sshll.u32 %s208_s29, 3  ;;  %s1261_s10 = scalar_lea.hbm %s1380_s0, %s803_s6 }
  0x34   : > { %s212_s11 = scalar_lea.vmem [#allocation2], %s802_s7  ;;  %p1263_p11 = pnand %p928_p9, %p38_p12 }
  0x35   : > { %s219_s12 = sshll.u32 %s212_s11, 4  ;;  %s209_s14 = scalar_lea.sflag [#allocation3], %s208_s29  ;;  %s220_s12 = int_to_ptr.vmem [resolvable:$true] %s219_s12 }
  0x36   : > { %s1028_s15 = scalar_lea.hbm %s1261_s10, 128  ;;  %p1030_p0 = pneg %p1263_p11 }
  0x37   : > { %p1029_p13 = scmp.ne.s32.totalorder %s1261_s10, %s1028_s15  ;;  %s1033_s27 = scalar_lea.hbm %s1380_s0, 256 }
  0x38   : > { %p1034_p1 = scmp.lt.s32.totalorder %s1261_s10, %s1380_s0  ;;  %p1035_p2 = scmp.lt.s32.totalorder %s1033_s27, %s1028_s15 }
  0x39   : > { %p1031_p5 = pnand %p1030_p0, %p1029_p13 }
  0x3a   : > { %p1036_p6 = por %p1035_p2, %p1034_p1 }
  0x3b   : > { %p1032_p10 = pneg %p1031_p5 }
  0x3d   : > { %p1037_p12 = pnand %p1036_p6, %p1032_p10 }
  0x3f   : > { %1040 = shalt.err (!%p1037_p12)
}
  0x40   : > { %s1041_s8 = scalar_lea.vmem %s220_s12, 128  ;;  %s1132_s29 = smov [#allocation2]  }
  0x41   : > { %p1042_p3 = scmp.ne.s32.totalorder %s220_s12, %s1041_s8  ;;  %s1046_s9 = sshll.u32 %s1132_s29, 4  ;;  %s1047_s9 = int_to_ptr.vmem [resolvable:$false] %s1046_s9 }
  0x42   : > { %s1048_s11 = scalar_lea.vmem %s1047_s9, 256  ;;  %p1049_p13 = scmp.lt.s32.totalorder %s220_s12, %s1047_s9 }
  0x43   : > { %p1044_p9 = pnand %p1042_p3, %p1030_p0  ;;  %p1050_p5 = scmp.lt.s32.totalorder %s1048_s11, %s1041_s8 }
  0x45   : > { %p1045_p7 = pneg %p1044_p9  ;;  %p1051_p4 = por %p1050_p5, %p1049_p13 }
  0x47   : > { %p1052_p8 = pnand %p1051_p4, %p1045_p7 }
  0x49   : > { %1055 = shalt.err (!%p1052_p8)
}
  0x4a   : > { %921 = dma.hbm_to_vmem [thread:$0]  (!%p1263_p11), %s1261_s10, 128, %s220_s12, %s209_s14  }
  0x4b   : > { %p1397_p10 = scmp.ne.s32.totalorder %s1392_s26, 0 }
  0x4c   : > { %s1284_s15 = sand.u32 (!%p1397_p10), 1, %s1116_s19   ;;  %p1398_p4 = scmp.ne.s32.totalorder (!%p1397_p10), %s1390_s24, 0 }
  0x4d   : > { %228 = sbr.rel (%p1397_p10) target bundleno = 1049 (0x419), region = 40  ;;  %s805_s16 = sshll.u32 (!%p1397_p10), %s1284_s15, 3 }
  0x4e   : > { %s231_s23 = scalar_lea.sflag (!%p1397_p10), [#allocation3], %s1284_s15  ;;  %s234_s27 = scalar_lea.vmem (!%p1397_p10), [#allocation2], %s805_s16 }
  0x52   : > { %1099 = dma.done.wait (%p1398_p4), %s231_s23, 128  }
  0x53   : > { %1101 = vsyncadd (%p1398_p4), %s231_s23, 4294967168  ;;  %p1399_p8 = scmp.eq.s32.totalorder %s1187_s22, 0 }
  0x55   : > { %1103 = dma.done.wait (%p1399_p8), [#allocation6], 3584   ;;  %p1400_p7 = pmov %p1399_p8 }
  0x56   : > { %v1133_v0 = vmov 0.0   ;;  %v280_v1 = vld [vmem:[#allocation5 + $0x50] sm:$0xff]  ;;  %v279_v2 = vld [vmem:[#allocation5 + $0x48] sm:$0xff]  ;;  %v277_v3 = vld [vmem:[#allocation5 + $0x38] sm:$0xff]  ;;  %vm299_vm0 = vcmask 261120   ;;  %vm1134_vm1 = vmmov 0   ;;  %v284_v14 = vlaneseq }
  0x57   : > { %1105 = vsyncadd (%p1400_p7), [#allocation6], 4294963712  ;;  %367 = vmatprep.mubr.f32.mxu1 %v1133_v0  ;;  %864 = vmatprep.subr.mxu0 %v1133_v0  ;;  %v276_v4 = vld [vmem:[#allocation5 + $0x30] sm:$0xff]  ;;  %v274_v5 = vld [vmem:[#allocation5 + $0x20] sm:$0xff]  ;;  %vm515_vm2 = vcmask 64512   ;;  %s814_s13 = sshll.u32 %s1187_s22, 7 }
  0x58   : > { %327 = vmatprep.subr.mxu1 %v280_v1  ;;  %v273_v6 = vld [vmem:[#allocation5 + $0x18] sm:$0xff]  ;;  %v271_v7 = vld [vmem:[#allocation5 + $0x8] sm:$0xff]  ;;  %v270_v8 = vld [vmem:[#allocation5] sm:$0xff]  ;;  %896 = vmatprep.mubr.msk.f32.mxu0 %vm1134_vm1, %v1133_v0  ;;  %v285_v15 = vshrl.u32 %v284_v14, 7  ;;  %s268_s14 = scalar_lea.vmem [#allocation8], %s805_s16  ;;  %s1343_s29 = scalar_lea.hbm %s1385_s5, %s814_s13 }
  0x59   : > { %328 = vmatpush1.msra.mxu1 %v279_v2  ;;  %v269_v9 = vld [vmem:[%s234_s27] sm:$0xff]  ;;  %v278_v11 = vld [vmem:[#allocation5 + $0x40] sm:$0xff]  ;;  %v275_v12 = vld [vmem:[#allocation5 + $0x28] sm:$0xff]  ;;  %s708_s6 = sshll.u32 %s268_s14, 4  ;;  %s695_s9 = scalar_lea.sflag [#allocation4], %s1284_s15  ;;  %s709_s6 = int_to_ptr.vmem [resolvable:$true] %s708_s6 }
  0x5a   : > { %329 = vmatprep.subr.mxu1 %v277_v3  ;;  %v281_v10 = vld [vmem:[#allocation5 + $0x58] sm:$0xff]  ;;  %v272_v13 = vld [vmem:[#allocation5 + $0x10] sm:$0xff]  ;;  %v294_v16 = vsub.s32 2, %v285_v15  ;;  %v286_v19 = vsub.s32 0, %v285_v15  ;;  %v290_v20 = vsub.s32 1, %v285_v15  ;;  %v613_v41 = vld [vmem:[#allocation7 + $0x68] sm:$0xff] }
  0x5b   : > { %330 = vmatpush1.msra.mxu1 %v276_v4  ;;  %v282_v17 = vld [vmem:[%s1382_s2] sm:$0x7]  ;;  %v615_v39 = vld [vmem:[#allocation7 + $0x78] sm:$0xff]  ;;  %v612_v42 = vld [vmem:[#allocation7 + $0x60] sm:$0xff]  ;;  %s1056_s11 = scalar_lea.vmem %s709_s6, 128  ;;  %p1401_p0 = scmp.ne.s32.totalorder %s1395_s30, 0 }
  0x5c   : > { %331 = vmatprep.subr.mxu1 %v274_v5  ;;  %v295_v18 = vrot.slane %v282_v17, %v294_v16  ;;  %v287_v21 = vrot.slane %v282_v17, %v286_v19  ;;  %v291_v22 = vrot.slane %v282_v17, %v290_v20  ;;  %v614_v40 = vld [vmem:[#allocation7 + $0x70] sm:$0xff]  ;;  %865 = vmatpush3.msra.mxu0 %v615_v39  ;;  %v611_v43 = vld [vmem:[#allocation7 + $0x58] sm:$0xff]  ;;  %v609_v45 = vld [vmem:[#allocation7 + $0x48] sm:$0xff]  ;;  %p1057_p11 = scmp.ne.s32.totalorder %s709_s6, %s1056_s11  ;;  %s1135_s22 = smov [#allocation8]  }
  0x5d   : > { %332 = vmatpush1.msra.mxu1 %v273_v6  ;;  %866 = vmatprep.subr.mxu0 %v1133_v0  ;;  %v610_v44 = vld [vmem:[#allocation7 + $0x50] sm:$0xff]  ;;  %v608_v46 = vld [vmem:[#allocation7 + $0x40] sm:$0xff]  ;;  %v607_v47 = vld [vmem:[#allocation7 + $0x38] sm:$0xff]  ;;  %s1060_s23 = sshll.u32 %s1135_s22, 4  ;;  %s1061_s23 = int_to_ptr.vmem [resolvable:$false] %s1060_s23 }
  0x5e   : > { %333 = vmatprep.subr.mxu1 %v271_v7  ;;  %867 = vmatpush3.msra.mxu0 %v614_v40  ;;  %v606_v48 = vld [vmem:[#allocation7 + $0x30] sm:$0xff]  ;;  %v605_v49 = vld [vmem:[#allocation7 + $0x28] sm:$0xff]  ;;  %v604_v50 = vld [vmem:[#allocation7 + $0x20] sm:$0xff]  ;;  %p1058_p1 = pnand %p1057_p11, %p1401_p0  ;;  %s1062_s16 = scalar_lea.vmem %s1061_s23, 256 }
  0x5f   : > { %334 = vmatpush1.msra.mxu1 %v270_v8  ;;  %868 = vmatprep.subr.mxu0 %v1133_v0  ;;  %v603_v51 = vld [vmem:[#allocation7 + $0x18] sm:$0xff]  ;;  %v602_v52 = vld [vmem:[#allocation7 + $0x10] sm:$0xff]  ;;  %v601_v53 = vld [vmem:[#allocation7 + $0x8] sm:$0xff]  ;;  %p1063_p6 = scmp.lt.s32.totalorder %s709_s6, %s1061_s23  ;;  %p1064_p12 = scmp.lt.s32.totalorder %s1062_s16, %s1056_s11 }
  0x60   : > { %809 = vmatmul.mubr.msk.f32.vlgmr.msra.gmra.mxu1 %vm299_vm0, %v269_v9  ;;  %843 = vmatprep.subr.mxu1 %v1133_v0  ;;  %v600_v54 = vld [vmem:[#allocation7] sm:$0xff]  ;;  %v812_v60 = vld [vmem:[%s1384_s4] ss:$0 sm:$0xff]  ;;  %p1059_p2 = pneg %p1058_p1 }
  0x61   : > { %844 = vmatpush3.msra.mxu1 %v281_v10  ;;  %851 = vmatprep.mubr.msk.f32.mxu1 %vm1134_vm1, %v1133_v0  ;;  %p1065_p3 = por %p1064_p12, %p1063_p6 }
  0x62   : > { %845 = vmatprep.subr.mxu1 %v1133_v0  ;;  %869 = vmatpush3.msra.mxu0 %v613_v41 }
  0x63   : > { %846 = vmatpush3.msra.mxu1 %v278_v11  ;;  %870 = vmatprep.subr.mxu0 %v1133_v0  ;;  %p1066_p9 = pnand %p1065_p3, %p1059_p2 }
  0x64   : > { %847 = vmatprep.subr.mxu1 %v1133_v0  ;;  %871 = vmatpush3.msra.mxu0 %v612_v42 }
  0x65   : > { %848 = vmatpush3.msra.mxu1 %v275_v12  ;;  %872 = vmatprep.subr.mxu0 %v1133_v0 }
  0x66   : > { %849 = vmatprep.subr.mxu1 %v1133_v0  ;;  %873 = vmatpush3.msra.mxu0 %v611_v43 }
  0x67   : > { %850 = vmatpush3.msra.mxu1 %v272_v13  ;;  %874 = vmatprep.subr.mxu0 %v1133_v0 }
  0x68   : > { %852 = vmatmul.mubr.msk.f32.vlgmr.msra.gmra.mxu1 %vm299_vm0, %v269_v9  ;;  %854 = vmatprep.subr.mxu1 %v1133_v0 }
  0x69   : > { %856 = vmatprep.mubr.msk.f32.mxu1 %vm1134_vm1, %v1133_v0  ;;  %875 = vmatpush3.msra.mxu0 %v610_v44 }
  0x6a   : > { %876 = vmatprep.subr.mxu0 %v1133_v0 }
  0x6b   : > { %877 = vmatpush3.msra.mxu0 %v609_v45 }
  0x6c   : > { %878 = vmatprep.subr.mxu0 %v1133_v0 }
  0x6d   : > { %879 = vmatpush3.msra.mxu0 %v608_v46 }
  0x6e   : > { %880 = vmatprep.subr.mxu0 %v1133_v0 }
  0x6f   : > { %881 = vmatpush3.msra.mxu0 %v607_v47 }
  0x70   : > { %882 = vmatprep.subr.mxu0 %v1133_v0 }
  0x71   : > { %883 = vmatpush3.msra.mxu0 %v606_v48 }
  0x72   : > { %884 = vmatprep.subr.mxu0 %v1133_v0 }
  0x73   : > { %885 = vmatpush3.msra.mxu0 %v605_v49 }
  0x74   : > { %886 = vmatprep.subr.mxu0 %v1133_v0 }
  0x75   : > { %887 = vmatpush3.msra.mxu0 %v604_v50 }
  0x76   : > { %888 = vmatprep.subr.mxu0 %v1133_v0 }
  0x77   : > { %889 = vmatpush3.msra.mxu0 %v603_v51 }
  0x78   : > { %890 = vmatprep.subr.mxu0 %v1133_v0 }
  0x79   : > { %891 = vmatpush3.msra.mxu0 %v602_v52 }
  0x7a   : > { %892 = vmatprep.subr.mxu0 %v1133_v0 }
  0x7b   : > { %893 = vmatpush3.msra.mxu0 %v601_v53 }
  0x7c   : > { %894 = vmatprep.subr.mxu0 %v1133_v0 }
  0x7d   : > { %895 = vmatpush3.msra.mxu0 %v600_v54 }
 0x120   : > { %v369_v23 = vpop.f32.mrf.mxu1 }
 0x121   : > { %v370_v24 = vadd.f32 %v369_v23, %v287_v21 }
 0x122   : > { %v371_v25 = vpop.f32.mrf.mxu1 }
 0x123   : > { %v372_v26 = vadd.f32 %v371_v25, %v291_v22  ;;  %v444_v27 = vmul.f32 0.17677669, %v370_v24 }
 0x125   : > { %855 = vmatpush3.xpose.msra.mxu1 %v372_v26 }
 0x126   : > { %859 = vmatprep.subr.mxu1 %v1133_v0 }
 0x128   : > { %857 = vmatmul.mubr.f32.vlgmr.msra.gmra.mxu1 %v444_v27  ;;  %v440_v28 = vpop.f32.mrf.mxu1 }
 0x129   : > { %861 = vmatprep.mubr.msk.f32.mxu1 %vm1134_vm1, %v1133_v0  ;;  %v441_v29 = vadd.f32 %v440_v28, %v295_v18 }
 0x12a   : > { %v853_v30 = vpop.f32.mrf.mxu1 }
 0x12b   : > { %860 = vmatpush3.msra.mxu1 %v441_v29 }
 0x1e8   : > { %v511_v31 = vpop.f32.mrf.mxu1 }
 0x1e9   : > { %v516_v32 = vsel %vm515_vm2, %v511_v31, -inf }
 0x1ea   : > { %517 = vmax.xlane.f32.xlu0 %v516_v32  ;;  %v858_v33 = vpop.f32.mrf.mxu1 }
 0x273   : > { %v518_v34 = vpop.xlane.xlu0 %517 }
 0x274   : > { %v519_v35 = vsub.f32 %v511_v31, %v518_v34 }
 0x276   : > { %v520_v36 = vmul.f32 1.442695, %v519_v35 }
 0x278   : > { %972 = vpow2.f32 %v520_v36 }
 0x285   : > { %v973_v37 = vpop.eup %972 }
 0x286   : > { %862 = vmatmul.mubr.msk.f32.vlgmr.msra.gmra.mxu1 %vm515_vm2, %v973_v37  ;;  %v522_v38 = vsel %vm515_vm2, %v973_v37, 0.0 }
 0x287   : > { %523 = vadd.xlane.f32.xlu0 %v522_v38 }
 0x310   : > { %v524_v55 = vpop.xlane.xlu0 %523 }
 0x311   : > { %974 = vrcp.f32 %v524_v55 }
 0x31e   : > { %v975_v56 = vpop.eup %974 }
 0x346   : > { %v594_v57 = vpop.f32.mrf.mxu1 }
 0x347   : > { %v599_v58 = vmul.f32 %v975_v56, %v594_v57 }
 0x348   : > { %v863_v59 = vpop.f32.mrf.mxu1 }
 0x349   : > { %897 = vmatmul.mubr.f32.vlgmr.msra.gmra.mxu0 %v599_v58 }
 0x409   : > { %v689_v61 = vpop.f32.mrf.mxu0 }
 0x40a   : > { %v690_v62 = vadd.f32 %v812_v60, %v689_v61 }
 0x40b   : > { %v898_v63 = vpop.f32.mrf.mxu0 }
 0x40c   : > { %693 = vst [vmem:[%s268_s14] sm:$0xff] %v690_v62 }
 0x40d   : > { %1069 = shalt.err (!%p1066_p9)
}
 0x40e   : > { %s1070_s27 = scalar_lea.hbm %s1343_s29, 128  ;;  %s1074_s26 = scalar_lea.hbm %s1385_s5, 256 }
 0x40f   : > { %p1071_p13 = scmp.ne.s32.totalorder %s1343_s29, %s1070_s27  ;;  %p1075_p4 = scmp.lt.s32.totalorder %s1343_s29, %s1385_s5 }
 0x410   : > { %p1076_p8 = scmp.lt.s32.totalorder %s1074_s26, %s1070_s27 }
 0x411   : > { %p1072_p5 = pnand %p1071_p13, %p1401_p0 }
 0x412   : > { %p1077_p7 = por %p1076_p8, %p1075_p4 }
 0x413   : > { %p1073_p10 = pneg %p1072_p5 }
 0x415   : > { %p1078_p11 = pnand %p1077_p7, %p1073_p10 }
 0x417   : > { %1081 = shalt.err (!%p1078_p11)
}
 0x418   : > { %909 = dma.vmem_to_hbm [thread:$0]  (%p1401_p0), %s709_s6, 128, %s1343_s29, %s695_s9  }
 0x419 PF: > { %s720_s13 = sand.u32 1, %s1112_s18   ;;  %p1402_p1 = scmp.ne.s32.totalorder %s1391_s25, 0 }
 0x41a   : > { %p1403_p2 = scmp.ge.s32.totalorder %s1124_s21, 2  ;;  %s721_s14 = scalar_lea.sflag [#allocation4], %s720_s13 }
 0x41c   : > { %p923_p6 = pnand %p1403_p2, %p1402_p1 }
 0x41e   : > { %p924_p12 = pneg %p923_p6 }
 0x420   : > { %1107 = dma.done.wait (%p924_p12), %s721_s14, 128  }
 0x421   : > { %1109 = vsyncadd (%p924_p12), %s721_s14, 4294967168  ;;  %p19_p3 = scmp.ge.s32.totalorder %s1238_s17, 4   ;;  %s1404_s18 = smov %s1116_s19 }
 0x422   : > { %s1405_s19 = smov %s1120_s20  ;;  %s1406_s20 = smov %s1247_s28 }
 0x423   : > { %s1407_s21 = smov %s1238_s17  ;;  %21 = sbr.rel (!%p19_p3) target bundleno = 6 (0x6), region = 93 }
 0x428   :  { %726 = vsyncpa [#allocation3], 1 }
 0x429   :  { %728 = vsyncpa [#allocation3 + $0x1], 1 }
 0x42a   :  { %729 = vsyncpa [#allocation6], 1 }
 0x42b   :  { %730 = vsyncpa [#allocation4], 1 }
 0x42c   :  { %732 = vsyncpa [#allocation4 + $0x1], 1 }

</bundles_post_ra>
